<compile_context>
chip_gen: v7x
topology: tpu7x:2x2x1
jax: 0.10.0
libtpu: 0.0.40
codegen_flags: <defaults>
</compile_context>

<pallas_src>
import functools
import math

import jax
import jax.numpy as jnp
from jax import lax
from jax.experimental import pallas as pl
from jax.experimental.pallas import tpu as pltpu


_INV_SQRT2 = 1.0 / math.sqrt(2.0)
_TANH_C = math.sqrt(2.0 / math.pi)

# Flipped to False (once) if this JAX build rejects pipeline_mode=pl.Buffered(1)
# on the constant-index weight BlockSpecs; the kernel then runs with the default
# double-buffered resident weights instead of failing.
_SINGLE_BUFFER_WEIGHTS_OK = True


def _round_up(x, m):
    return (x + m - 1) // m * m


@functools.lru_cache(maxsize=None)
def _vmem_capacity_bytes():
    """Per-core VMEM capacity (128 MiB v5e/v6e, 64 MiB v7x); conservative fallback."""
    try:
        return int(pltpu.get_tpu_info().vmem_capacity_bytes)
    except Exception:
        return 64 << 20


def _as_dtype(a, dtype):
    return a if a.dtype == dtype else a.astype(dtype)


def _pad2d(a, rows, cols):
    r, c = a.shape
    if (r, c) == (rows, cols):
        return a
    return jnp.pad(a, ((0, rows - r), (0, cols - c)))


def _gelu_f32(h, approx):
    if approx:
        # tanh formulation: the transcendental goes to the EUP slot (nearly free
        # next to the MXU on v6e/v7x); ~1e-3 deviation from exact erf GELU.
        return 0.5 * h * (1.0 + jnp.tanh(_TANH_C * (h + 0.044715 * h * h * h)))
    # exact erf GELU — matches the PyTorch reference semantics.
    return h * 0.5 * (1.0 + lax.erf(h * _INV_SQRT2))


# --------------------------------------------------------------------------- #
# Kernels
# --------------------------------------------------------------------------- #
def _ffn_resident_kernel(x_ref, w1_ref, b1_ref, w2_ref, b2_ref, o_ref, acc_ref,
                         *, ff_chunk, n_chunks, approx_gelu):
    """One row tile of fc2(gelu(fc1(x))) with both weights VMEM-resident.

    x_ref : [TM, Dp]  input dtype (cast to the MXU dtype in-kernel)
    w1_ref: [Dp, Fp]  bf16     b1_ref: [1, Fp]  f32
    w2_ref: [Fp, Dp]  bf16     b2_ref: [1, Dp]  f32
    o_ref : [TM, Dp]  input dtype
    acc_ref:[TM, Dp]  f32 VMEM scratch accumulator
    """
    x = x_ref[...].astype(w1_ref.dtype)
    # Seed the accumulator with b2: removes the zero-fill and the final +b2 pass.
    acc_ref[...] = jnp.broadcast_to(b2_ref[...], acc_ref.shape)

    def body(c, carry):
        lo = pl.multiple_of(c * ff_chunk, 128)
        w1c = w1_ref[:, pl.ds(lo, ff_chunk)]          # [Dp, Fc] bf16
        b1c = b1_ref[:, pl.ds(lo, ff_chunk)]          # [1,  Fc] f32
        w2c = w2_ref[pl.ds(lo, ff_chunk), :]          # [Fc, Dp] bf16
        h = jnp.dot(x, w1c, preferred_element_type=jnp.float32) + b1c
        g = _gelu_f32(h, approx_gelu)
        acc_ref[...] += jnp.dot(g.astype(w2c.dtype), w2c,
                                preferred_element_type=jnp.float32)
        return carry

    lax.fori_loop(0, n_chunks, body, 0, unroll=(n_chunks <= 8))
    o_ref[...] = acc_ref[...].astype(o_ref.dtype)


def _ffn_streaming_kernel(x_ref, w1_ref, b1_ref, w2_ref, b2_ref, o_ref, acc_ref,
                          *, approx_gelu):
    """Weight-streaming variant: grid axis 1 walks d_ff chunks; the w1/w2 chunk
    blocks are streamed by the BlockSpec pipeline and the f32 accumulator lives
    in VMEM scratch across the 'arbitrary' reduction axis."""
    k = pl.program_id(1)

    @pl.when(k == 0)
    def _():
        acc_ref[...] = jnp.broadcast_to(b2_ref[...], acc_ref.shape)

    x = x_ref[...].astype(w1_ref.dtype)
    h = jnp.dot(x, w1_ref[...], preferred_element_type=jnp.float32) + b1_ref[...]
    g = _gelu_f32(h, approx_gelu)
    acc_ref[...] += jnp.dot(g.astype(w2_ref.dtype), w2_ref[...],
                            preferred_element_type=jnp.float32)

    @pl.when(k == pl.num_programs(1) - 1)
    def _():
        o_ref[...] = acc_ref[...].astype(o_ref.dtype)


# --------------------------------------------------------------------------- #
# VMEM budgeting
# --------------------------------------------------------------------------- #
def _resident_vmem_bytes(row_tile, d_model_p, d_ff_p, ff_chunk,
                         x_bytes, out_bytes, w_bytes, weight_buffers):
    return int(
        weight_buffers * 2 * d_model_p * d_ff_p * w_bytes      # w1 + w2 resident
        + weight_buffers * (d_ff_p + d_model_p) * 4            # b1 + b2 (f32)
        + 2 * row_tile * d_model_p * x_bytes                   # x tile (dbl buf)
        + 2 * row_tile * d_model_p * out_bytes                 # out tile (dbl buf)
        + row_tile * d_model_p * 4                             # f32 accumulator
        + row_tile * d_model_p * w_bytes                       # in-kernel bf16 x copy
        + 3 * row_tile * ff_chunk * 4                          # h / gelu temporaries
    )


def _streaming_vmem_bytes(row_tile, d_model_p, ff_chunk,
                          x_bytes, out_bytes, w_bytes):
    return int(
        2 * 2 * d_model_p * ff_chunk * w_bytes                 # w1/w2 chunks (dbl buf)
        + 2 * (ff_chunk + d_model_p) * 4                       # b1 chunk + b2
        + 2 * row_tile * d_model_p * x_bytes
        + 2 * row_tile * d_model_p * out_bytes
        + row_tile * d_model_p * 4
        + row_tile * d_model_p * w_bytes
        + 3 * row_tile * ff_chunk * 4
    )


# --------------------------------------------------------------------------- #
# pallas_call wrapper
# --------------------------------------------------------------------------- #
@functools.partial(
    jax.jit,
    static_argnames=("d_model_p", "d_ff_p", "ff_chunk", "n_chunks", "row_tile",
                     "M_pad", "mode", "single_buffer_weights", "vmem_limit",
                     "mxu_dtype", "approx_gelu"))
def _ffn_impl(x, w1, b1, w2, b2, *, d_model_p, d_ff_p, ff_chunk, n_chunks,
              row_tile, M_pad, mode, single_buffer_weights, vmem_limit,
              mxu_dtype, approx_gelu):
    B, S, d_model = x.shape
    d_ff = w1.shape[1]
    M = B * S
    out_dtype = x.dtype

    # x stays in its original dtype (bf16 cast happens *inside* the kernel: one
    # HBM read instead of read-f32 + write-bf16 + re-read-bf16 wrapper pass).
    x2d = _pad2d(x.reshape(M, d_model), M_pad, d_model_p)
    # Weight cast/pad are no-ops if the caller already stores padded bf16
    # weights / f32 biases (recommended: convert once, not per call).
    w1p = _pad2d(_as_dtype(w1, mxu_dtype), d_model_p, d_ff_p)
    w2p = _pad2d(_as_dtype(w2, mxu_dtype), d_ff_p, d_model_p)
    b1p = _pad2d(_as_dtype(b1, jnp.float32).reshape(1, d_ff), 1, d_ff_p)
    b2p = _pad2d(_as_dtype(b2, jnp.float32).reshape(1, d_model), 1, d_model_p)

    if mode == "resident":
        # Constant index_map -> a single buffer suffices (no re-DMA ever issued).
        wkw = ({"pipeline_mode": pl.Buffered(buffer_count=1)}
               if single_buffer_weights else {})
        in_specs = [
            pl.BlockSpec((row_tile, d_model_p), lambda i: (i, 0)),       # x rows
            pl.BlockSpec((d_model_p, d_ff_p), lambda i: (0, 0), **wkw),  # w1
            pl.BlockSpec((1, d_ff_p), lambda i: (0, 0), **wkw),          # b1
            pl.BlockSpec((d_ff_p, d_model_p), lambda i: (0, 0), **wkw),  # w2
            pl.BlockSpec((1, d_model_p), lambda i: (0, 0), **wkw),       # b2
        ]
        out_spec = pl.BlockSpec((row_tile, d_model_p), lambda i: (i, 0))
        grid = (M_pad // row_tile,)
        dims = ("parallel",)
        kernel = functools.partial(_ffn_resident_kernel, ff_chunk=ff_chunk,
                                   n_chunks=n_chunks, approx_gelu=approx_gelu)
    else:  # "streaming": weights too large to keep resident (e.g. v7x 64 MiB)
        in_specs = [
            pl.BlockSpec((row_tile, d_model_p), lambda i, k: (i, 0)),    # x rows
            pl.BlockSpec((d_model_p, ff_chunk), lambda i, k: (0, k)),    # w1 chunk
            pl.BlockSpec((1, ff_chunk), lambda i, k: (0, k)),            # b1 chunk
            pl.BlockSpec((ff_chunk, d_model_p), lambda i, k: (k, 0)),    # w2 chunk
            pl.BlockSpec((1, d_model_p), lambda i, k: (0, 0)),           # b2
        ]
        out_spec = pl.BlockSpec((row_tile, d_model_p), lambda i, k: (i, 0))
        grid = (M_pad // row_tile, n_chunks)
        dims = ("parallel", "arbitrary")
        kernel = functools.partial(_ffn_streaming_kernel, approx_gelu=approx_gelu)

    # TODO(synk): on v7x verify the "parallel" row axis shards across both
    # TensorCores; if not, switch that axis to pltpu.CORE_PARALLEL.
    out2d = pl.pallas_call(
        kernel,
        out_shape=jax.ShapeDtypeStruct((M_pad, d_model_p), out_dtype),
        grid_spec=pltpu.PrefetchScalarGridSpec(
            num_scalar_prefetch=0,
            grid=grid,
            in_specs=in_specs,
            out_specs=out_spec,
            scratch_shapes=[pltpu.VMEM((row_tile, d_model_p), jnp.float32)],
        ),
        compiler_params=pltpu.CompilerParams(
            dimension_semantics=dims,
            vmem_limit_bytes=vmem_limit,
        ),
    )(x2d, w1p, b1p, w2p, b2p)

    return out2d[:M, :d_model].reshape(B, S, d_model)


def poswise_ffn(x, w1, b1, w2, b2, *, row_tile=None, ff_chunk=None,
                mxu_dtype=jnp.bfloat16, approx_gelu=False, force_mode=None):
    """out = fc2(gelu(fc1(x))).

    x : [B, S, d_model]; w1: [d_model, d_ff]; b1: [d_ff];
    w2: [d_ff, d_model]; b2: [d_model].  Returns [B, S, d_model] in x.dtype.
    Weights are stored [in, out] (transpose of nn.Linear.weight).  Passing
    weights already cast to `mxu_dtype` (and pre-padded) makes the per-call
    prep pass a no-op.
    """
    global _SINGLE_BUFFER_WEIGHTS_OK
    assert force_mode in (None, "resident", "streaming")
    B, S, d_model = x.shape
    d_ff = w1.shape[1]
    M = B * S

    # ---- generation-aware static configuration -----------------------------
    cap = _vmem_capacity_bytes()                 # 128 MiB v5e/v6e, 64 MiB v7x
    budget = cap - max(8 << 20, cap // 8)        # headroom for internal scratch
    big_vmem = cap >= (96 << 20)
    rt = row_tile if row_tile is not None else (1024 if big_vmem else 512)
    fc = ff_chunk if ff_chunk is not None else (1024 if big_vmem else 512)

    # lane-dense feature padding (multiples of 128)
    d_model_p = _round_up(d_model, 128)
    d_ff_128 = _round_up(d_ff, 128)

    # d_ff chunking: pad d_ff UP to a multiple of ff_chunk instead of shrinking
    # ff_chunk, keeping the fc2 contraction dim >= 256 for the 256x256 MXUs.
    fc = max(128, min(_round_up(fc, 128), d_ff_128))
    if d_ff_128 >= 256:
        fc = max(fc, 256)
    d_ff_p = _round_up(d_ff_128, fc)
    n_chunks = d_ff_p // fc

    rt = max(8, min(_round_up(rt, 8), _round_up(M, 8)))

    x_bytes = jnp.dtype(x.dtype).itemsize
    w_bytes = jnp.dtype(mxu_dtype).itemsize
    wbuf = 1 if _SINGLE_BUFFER_WEIGHTS_OK else 2

    # Resident weights if they (plus the row-tile working set) fit the budget,
    # shrinking the row tile before giving up; otherwise stream weight chunks.
    mode, need = None, None
    rt_try = rt
    while True:
        need = _resident_vmem_bytes(rt_try, d_model_p, d_ff_p, fc,
                                    x_bytes, x_bytes, w_bytes, wbuf)
        if need <= budget:
            mode, rt = "resident", rt_try
            break
        if rt_try <= 256:
            break
        rt_try = max(256, rt_try // 2)
    if mode is None:
        mode = "streaming"
        rt_try = rt
        while (_streaming_vmem_bytes(rt_try, d_model_p, fc, x_bytes, x_bytes,
                                     w_bytes) > budget and rt_try > 256):
            rt_try = max(256, rt_try // 2)
        rt = rt_try
        need = _streaming_vmem_bytes(rt, d_model_p, fc, x_bytes, x_bytes, w_bytes)
    if force_mode is not None:
        mode = force_mode

    M_pad = _round_up(M, rt)
    vmem_limit = int(min(max(need * 5 // 4 + (4 << 20), 32 << 20), budget))

    kwargs = dict(d_model_p=d_model_p, d_ff_p=d_ff_p, ff_chunk=fc,
                  n_chunks=n_chunks, row_tile=rt, M_pad=M_pad, mode=mode,
                  vmem_limit=vmem_limit, mxu_dtype=mxu_dtype,
                  approx_gelu=approx_gelu)

    if mode == "resident" and _SINGLE_BUFFER_WEIGHTS_OK:
        try:
            return _ffn_impl(x, w1, b1, w2, b2,
                             single_buffer_weights=True, **kwargs)
        except Exception:
            # This JAX build does not lower pipeline_mode=pl.Buffered(1) for the
            # top-level pipeline; retry once with default double buffering.
            _SINGLE_BUFFER_WEIGHTS_OK = False
            return poswise_ffn(x, w1, b1, w2, b2, row_tile=row_tile,
                               ff_chunk=ff_chunk, mxu_dtype=mxu_dtype,
                               approx_gelu=approx_gelu, force_mode=force_mode)
    return _ffn_impl(x, w1, b1, w2, b2, single_buffer_weights=False, **kwargs)


def _init_linear(key, in_features, out_features, dtype=jnp.float32):
    """Deterministic init mimicking nn.Linear (uniform +/- 1/sqrt(in)).
    Returns weight already transposed to [in, out] plus bias [out]."""
    kw, kb = jax.random.split(key)
    bound = 1.0 / math.sqrt(in_features)
    w = jax.random.uniform(kw, (in_features, out_features), dtype,
                           minval=-bound, maxval=bound)
    b = jax.random.uniform(kb, (out_features,), dtype,
                           minval=-bound, maxval=bound)
    return w, b


if __name__ == "__main__":
    # Small config: batch=2, seq_len=8, d_model=32, d_ff=64
    B, S, d_model, d_ff = 2, 8, 32, 64

    key = jax.random.PRNGKey(0)
    kx, k1, k2 = jax.random.split(key, 3)

    x = jax.random.normal(kx, (B, S, d_model), jnp.float32)
    w1, b1 = _init_linear(k1, d_model, d_ff)
    w2, b2 = _init_linear(k2, d_ff, d_model)

    # Pure-f32 reference of the PyTorch module (loose check for the bf16 path).
    x2d = x.reshape(-1, d_model)
    h_f = x2d @ w1 + b1
    g_f = h_f * 0.5 * (1.0 + lax.erf(h_f * _INV_SQRT2))
    ref_f = (g_f @ w2 + b2).reshape(B, S, d_model)

    # Reference with matching bf16 MXU operands / f32 accumulation (tight check).
    h_m = jnp.dot(x2d.astype(jnp.bfloat16), w1.astype(jnp.bfloat16),
                  preferred_element_type=jnp.float32) + b1
    g_m = h_m * 0.5 * (1.0 + lax.erf(h_m * _INV_SQRT2))
    ref_m = (jnp.dot(g_m.astype(jnp.bfloat16), w2.astype(jnp.bfloat16),
                     preferred_element_type=jnp.float32) + b2).reshape(B, S, d_model)

    # Default path (weight-resident).
    out = jax.block_until_ready(poswise_ffn(x, w1, b1, w2, b2))
    assert out.shape == (B, S, d_model)
    assert out.dtype == x.dtype
    assert jnp.allclose(out, ref_m, atol=1e-3, rtol=1e-3), "mismatch vs matched reference"
    assert jnp.allclose(out, ref_f, atol=5e-2, rtol=5e-2), "mismatch vs f32 reference"

    # Weight-streaming path (selected automatically when w1/w2 exceed the VMEM
    # budget, e.g. very large d_ff on v7x); exercised here explicitly.
    out_s = jax.block_until_ready(
        poswise_ffn(x, w1, b1, w2, b2, force_mode="streaming"))
    assert jnp.allclose(out_s, ref_m, atol=1e-3, rtol=1e-3), "streaming path mismatch"

    print("KERNEL_OK")
</pallas_src>

<mosaic_0001>
module attributes {stable_mosaic.version = 11 : i64} {
  func.func @_ffn_resident_kernel(%arg0: i32, %arg1: memref<16x128xf32, #tpu.memory_space<vmem>>, %arg2: memref<128x128xbf16, #tpu.memory_space<vmem>>, %arg3: memref<1x128xf32, #tpu.memory_space<vmem>>, %arg4: memref<128x128xbf16, #tpu.memory_space<vmem>>, %arg5: memref<1x128xf32, #tpu.memory_space<vmem>>, %arg6: memref<16x128xf32, #tpu.memory_space<vmem>>, %arg7: memref<16x128xf32, #tpu.memory_space<vmem>>) attributes {dimension_semantics = [#tpu.dimension_semantics<parallel>], iteration_bounds = array<i64: 1>, scalar_prefetch = 0 : i64, scratch_operands = 1 : i64, tpu.core_type = #tpu.core_type<tc>, window_params = [{transform_indices = @transform_0, window_bounds = array<i64: 16, 128>}, {pipeline_mode = #tpu.pipeline_mode<synchronous>, transform_indices = @transform_1, window_bounds = array<i64: 128, 128>}, {pipeline_mode = #tpu.pipeline_mode<synchronous>, transform_indices = @transform_2, window_bounds = array<i64: 1, 128>}, {pipeline_mode = #tpu.pipeline_mode<synchronous>, transform_indices = @transform_3, window_bounds = array<i64: 128, 128>}, {pipeline_mode = #tpu.pipeline_mode<synchronous>, transform_indices = @transform_4, window_bounds = array<i64: 1, 128>}, {transform_indices = @transform_5, window_bounds = array<i64: 16, 128>}]} {
    %c0 = arith.constant 0 : index
    %c0_0 = arith.constant 0 : index
    %0 = vector.load %arg1[%c0, %c0_0] : memref<16x128xf32, #tpu.memory_space<vmem>>, vector<16x128xf32>
    %1 = arith.truncf %0 : vector<16x128xf32> to vector<16x128xbf16>
    %c0_1 = arith.constant 0 : index
    %c0_2 = arith.constant 0 : index
    %2 = vector.load %arg5[%c0_1, %c0_2] : memref<1x128xf32, #tpu.memory_space<vmem>>, vector<1x128xf32>
    %3 = vector.shape_cast %2 : vector<1x128xf32> to vector<1x128xf32>
    %4 = vector.broadcast %3 : vector<1x128xf32> to vector<16x128xf32>
    %c0_3 = arith.constant 0 : index
    %c0_4 = arith.constant 0 : index
    %5 = vector.load %arg7[%c0_3, %c0_4] : memref<16x128xf32, #tpu.memory_space<vmem>>, vector<16x128xf32>
    tpu.vector_store %arg7[%c0_3, %c0_4], %4 {strides = array<i32>} : memref<16x128xf32, #tpu.memory_space<vmem>>, vector<16x128xf32>,
    %c0_i32 = arith.constant 0 : i32
    %c128_i32 = arith.constant 128 : i32
    %6 = arith.muli %c0_i32, %c128_i32 : i32
    %7 = tpu.assume_multiple %6, 128 : i32
    %c0_5 = arith.constant 0 : index
    %8 = arith.index_cast %7 : i32 to index
    %9 = vector.load %arg2[%c0_5, %8] : memref<128x128xbf16, #tpu.memory_space<vmem>>, vector<128x128xbf16>
    %c0_6 = arith.constant 0 : index
    %10 = arith.index_cast %7 : i32 to index
    %11 = vector.load %arg3[%c0_6, %10] : memref<1x128xf32, #tpu.memory_space<vmem>>, vector<1x128xf32>
    %12 = arith.index_cast %7 : i32 to index
    %c0_7 = arith.constant 0 : index
    %13 = vector.load %arg4[%12, %c0_7] : memref<128x128xbf16, #tpu.memory_space<vmem>>, vector<128x128xbf16>
    %cst = arith.constant dense<0.000000e+00> : vector<16x128xf32>
    %14 = tpu.matmul %1, %9, %cst {dimension_numbers = #tpu.dot_dimension_numbers<[1], [0], [0], [1], [0, 0, 1, 1], [], []>} : vector<16x128xbf16>, vector<128x128xbf16>, vector<16x128xf32> -> vector<16x128xf32>
    %15 = vector.broadcast %11 : vector<1x128xf32> to vector<16x128xf32>
    %16 = arith.addf %14, %15 : vector<16x128xf32>
    %cst_8 = arith.constant 5.000000e-01 : f32
    %17 = vector.broadcast %cst_8 : f32 to vector<16x128xf32>
    %18 = arith.mulf %16, %17 : vector<16x128xf32>
    %cst_9 = arith.constant 0.707106769 : f32
    %19 = vector.broadcast %cst_9 : f32 to vector<16x128xf32>
    %20 = arith.mulf %16, %19 : vector<16x128xf32>
    %21 = math.erf %20 : vector<16x128xf32>
    %cst_10 = arith.constant 1.000000e+00 : f32
    %22 = vector.broadcast %cst_10 : f32 to vector<16x128xf32>
    %23 = arith.addf %22, %21 : vector<16x128xf32>
    %24 = arith.mulf %18, %23 : vector<16x128xf32>
    %c0_11 = arith.constant 0 : index
    %c0_12 = arith.constant 0 : index
    %25 = vector.load %arg7[%c0_11, %c0_12] : memref<16x128xf32, #tpu.memory_space<vmem>>, vector<16x128xf32>
    %26 = arith.truncf %24 : vector<16x128xf32> to vector<16x128xbf16>
    %cst_13 = arith.constant dense<0.000000e+00> : vector<16x128xf32>
    %27 = tpu.matmul %26, %13, %cst_13 {dimension_numbers = #tpu.dot_dimension_numbers<[1], [0], [0], [1], [0, 0, 1, 1], [], []>} : vector<16x128xbf16>, vector<128x128xbf16>, vector<16x128xf32> -> vector<16x128xf32>
    %28 = arith.addf %25, %27 : vector<16x128xf32>
    %c0_14 = arith.constant 0 : index
    %c0_15 = arith.constant 0 : index
    %29 = vector.load %arg7[%c0_14, %c0_15] : memref<16x128xf32, #tpu.memory_space<vmem>>, vector<16x128xf32>
    tpu.vector_store %arg7[%c0_14, %c0_15], %28 {strides = array<i32>} : memref<16x128xf32, #tpu.memory_space<vmem>>, vector<16x128xf32>,
    %c1_i32 = arith.constant 1 : i32
    %c0_16 = arith.constant 0 : index
    %c0_17 = arith.constant 0 : index
    %30 = vector.load %arg7[%c0_16, %c0_17] : memref<16x128xf32, #tpu.memory_space<vmem>>, vector<16x128xf32>
    %c0_18 = arith.constant 0 : index
    %c0_19 = arith.constant 0 : index
    %31 = vector.load %arg6[%c0_18, %c0_19] : memref<16x128xf32, #tpu.memory_space<vmem>>, vector<16x128xf32>
    tpu.vector_store %arg6[%c0_18, %c0_19], %30 {strides = array<i32>} : memref<16x128xf32, #tpu.memory_space<vmem>>, vector<16x128xf32>,
    return
  }
  func.func @transform_0(%arg0: i32) -> (i32, i32) {
    %c0_i32 = arith.constant 0 : i32
    %c0_i32_0 = arith.constant 0 : i32
    return %arg0, %c0_i32 : i32, i32
  }
  func.func @transform_1(%arg0: i32) -> (i32, i32) {
    %c0_i32 = arith.constant 0 : i32
    %c0_i32_0 = arith.constant 0 : i32
    %c0_i32_1 = arith.constant 0 : i32
    return %c0_i32, %c0_i32_0 : i32, i32
  }
  func.func @transform_2(%arg0: i32) -> (i32, i32) {
    %c0_i32 = arith.constant 0 : i32
    %c0_i32_0 = arith.constant 0 : i32
    %c0_i32_1 = arith.constant 0 : i32
    return %c0_i32, %c0_i32_0 : i32, i32
  }
  func.func @transform_3(%arg0: i32) -> (i32, i32) {
    %c0_i32 = arith.constant 0 : i32
    %c0_i32_0 = arith.constant 0 : i32
    %c0_i32_1 = arith.constant 0 : i32
    return %c0_i32, %c0_i32_0 : i32, i32
  }
  func.func @transform_4(%arg0: i32) -> (i32, i32) {
    %c0_i32 = arith.constant 0 : i32
    %c0_i32_0 = arith.constant 0 : i32
    %c0_i32_1 = arith.constant 0 : i32
    return %c0_i32, %c0_i32_0 : i32, i32
  }
  func.func @transform_5(%arg0: i32) -> (i32, i32) {
    %c0_i32 = arith.constant 0 : i32
    %c0_i32_0 = arith.constant 0 : i32
    return %arg0, %c0_i32 : i32, i32
  }
}

module attributes {stable_mosaic.version = 11 : i64} {
  func.func @_ffn_resident_kernel(%arg0: i32, %arg1: memref<16x128xf32, #tpu.memory_space<vmem>>, %arg2: memref<128x128xbf16, #tpu.memory_space<vmem>>, %arg3: memref<1x128xf32, #tpu.memory_space<vmem>>, %arg4: memref<128x128xbf16, #tpu.memory_space<vmem>>, %arg5: memref<1x128xf32, #tpu.memory_space<vmem>>, %arg6: memref<16x128xf32, #tpu.memory_space<vmem>>, %arg7: memref<16x128xf32, #tpu.memory_space<vmem>>) attributes {dimension_semantics = [#tpu.dimension_semantics<parallel>], iteration_bounds = array<i64: 1>, scalar_prefetch = 0 : i64, scratch_operands = 1 : i64, tpu.core_type = #tpu.core_type<tc>, window_params = [{transform_indices = @transform_0, window_bounds = array<i64: 16, 128>}, {pipeline_mode = #tpu.pipeline_mode<synchronous>, transform_indices = @transform_1, window_bounds = array<i64: 128, 128>}, {pipeline_mode = #tpu.pipeline_mode<synchronous>, transform_indices = @transform_2, window_bounds = array<i64: 1, 128>}, {pipeline_mode = #tpu.pipeline_mode<synchronous>, transform_indices = @transform_3, window_bounds = array<i64: 128, 128>}, {pipeline_mode = #tpu.pipeline_mode<synchronous>, transform_indices = @transform_4, window_bounds = array<i64: 1, 128>}, {transform_indices = @transform_5, window_bounds = array<i64: 16, 128>}]} {
    %c0 = arith.constant 0 : index
    %c0_0 = arith.constant 0 : index
    %0 = vector.load %arg1[%c0, %c0_0] : memref<16x128xf32, #tpu.memory_space<vmem>>, vector<16x128xf32>
    %1 = arith.truncf %0 : vector<16x128xf32> to vector<16x128xbf16>
    %c0_1 = arith.constant 0 : index
    %c0_2 = arith.constant 0 : index
    %2 = vector.load %arg5[%c0_1, %c0_2] : memref<1x128xf32, #tpu.memory_space<vmem>>, vector<1x128xf32>
    %3 = vector.shape_cast %2 : vector<1x128xf32> to vector<1x128xf32>
    %4 = vector.broadcast %3 : vector<1x128xf32> to vector<16x128xf32>
    %c0_3 = arith.constant 0 : index
    %c0_4 = arith.constant 0 : index
    %5 = vector.load %arg7[%c0_3, %c0_4] : memref<16x128xf32, #tpu.memory_space<vmem>>, vector<16x128xf32>
    tpu.vector_store %arg7[%c0_3, %c0_4], %4 {strides = array<i32>} : memref<16x128xf32, #tpu.memory_space<vmem>>, vector<16x128xf32>,
    %c0_i32 = arith.constant 0 : i32
    %c128_i32 = arith.constant 128 : i32
    %6 = arith.muli %c0_i32, %c128_i32 : i32
    %7 = tpu.assume_multiple %6, 128 : i32
    %c0_5 = arith.constant 0 : index
    %8 = arith.index_cast %7 : i32 to index
    %9 = vector.load %arg2[%c0_5, %8] : memref<128x128xbf16, #tpu.memory_space<vmem>>, vector<128x128xbf16>
    %c0_6 = arith.constant 0 : index
    %10 = arith.index_cast %7 : i32 to index
    %11 = vector.load %arg3[%c0_6, %10] : memref<1x128xf32, #tpu.memory_space<vmem>>, vector<1x128xf32>
    %12 = arith.index_cast %7 : i32 to index
    %c0_7 = arith.constant 0 : index
    %13 = vector.load %arg4[%12, %c0_7] : memref<128x128xbf16, #tpu.memory_space<vmem>>, vector<128x128xbf16>
    %cst = arith.constant dense<0.000000e+00> : vector<16x128xf32>
    %14 = tpu.matmul %1, %9, %cst {dimension_numbers = #tpu.dot_dimension_numbers<[1], [0], [0], [1], [0, 0, 1, 1], [], []>} : vector<16x128xbf16>, vector<128x128xbf16>, vector<16x128xf32> -> vector<16x128xf32>
    %15 = vector.broadcast %11 : vector<1x128xf32> to vector<16x128xf32>
    %16 = arith.addf %14, %15 : vector<16x128xf32>
    %cst_8 = arith.constant 5.000000e-01 : f32
    %17 = vector.broadcast %cst_8 : f32 to vector<16x128xf32>
    %18 = arith.mulf %16, %17 : vector<16x128xf32>
    %cst_9 = arith.constant 0.707106769 : f32
    %19 = vector.broadcast %cst_9 : f32 to vector<16x128xf32>
    %20 = arith.mulf %16, %19 : vector<16x128xf32>
    %21 = math.erf %20 : vector<16x128xf32>
    %cst_10 = arith.constant 1.000000e+00 : f32
    %22 = vector.broadcast %cst_10 : f32 to vector<16x128xf32>
    %23 = arith.addf %22, %21 : vector<16x128xf32>
    %24 = arith.mulf %18, %23 : vector<16x128xf32>
    %c0_11 = arith.constant 0 : index
    %c0_12 = arith.constant 0 : index
    %25 = vector.load %arg7[%c0_11, %c0_12] : memref<16x128xf32, #tpu.memory_space<vmem>>, vector<16x128xf32>
    %26 = arith.truncf %24 : vector<16x128xf32> to vector<16x128xbf16>
    %cst_13 = arith.constant dense<0.000000e+00> : vector<16x128xf32>
    %27 = tpu.matmul %26, %13, %cst_13 {dimension_numbers = #tpu.dot_dimension_numbers<[1], [0], [0], [1], [0, 0, 1, 1], [], []>} : vector<16x128xbf16>, vector<128x128xbf16>, vector<16x128xf32> -> vector<16x128xf32>
    %28 = arith.addf %25, %27 : vector<16x128xf32>
    %c0_14 = arith.constant 0 : index
    %c0_15 = arith.constant 0 : index
    %29 = vector.load %arg7[%c0_14, %c0_15] : memref<16x128xf32, #tpu.memory_space<vmem>>, vector<16x128xf32>
    tpu.vector_store %arg7[%c0_14, %c0_15], %28 {strides = array<i32>} : memref<16x128xf32, #tpu.memory_space<vmem>>, vector<16x128xf32>,
    %c1_i32 = arith.constant 1 : i32
    %c0_16 = arith.constant 0 : index
    %c0_17 = arith.constant 0 : index
    %30 = vector.load %arg7[%c0_16, %c0_17] : memref<16x128xf32, #tpu.memory_space<vmem>>, vector<16x128xf32>
    %c0_18 = arith.constant 0 : index
    %c0_19 = arith.constant 0 : index
    %31 = vector.load %arg6[%c0_18, %c0_19] : memref<16x128xf32, #tpu.memory_space<vmem>>, vector<16x128xf32>
    tpu.vector_store %arg6[%c0_18, %c0_19], %30 {strides = array<i32>} : memref<16x128xf32, #tpu.memory_space<vmem>>, vector<16x128xf32>,
    return
  }
  func.func @transform_0(%arg0: i32) -> (i32, i32) {
    %c0_i32 = arith.constant 0 : i32
    %c0_i32_0 = arith.constant 0 : i32
    return %arg0, %c0_i32 : i32, i32
  }
  func.func @transform_1(%arg0: i32) -> (i32, i32) {
    %c0_i32 = arith.constant 0 : i32
    %c0_i32_0 = arith.constant 0 : i32
    %c0_i32_1 = arith.constant 0 : i32
    return %c0_i32, %c0_i32_0 : i32, i32
  }
  func.func @transform_2(%arg0: i32) -> (i32, i32) {
    %c0_i32 = arith.constant 0 : i32
    %c0_i32_0 = arith.constant 0 : i32
    %c0_i32_1 = arith.constant 0 : i32
    return %c0_i32, %c0_i32_0 : i32, i32
  }
  func.func @transform_3(%arg0: i32) -> (i32, i32) {
    %c0_i32 = arith.constant 0 : i32
    %c0_i32_0 = arith.constant 0 : i32
    %c0_i32_1 = arith.constant 0 : i32
    return %c0_i32, %c0_i32_0 : i32, i32
  }
  func.func @transform_4(%arg0: i32) -> (i32, i32) {
    %c0_i32 = arith.constant 0 : i32
    %c0_i32_0 = arith.constant 0 : i32
    %c0_i32_1 = arith.constant 0 : i32
    return %c0_i32, %c0_i32_0 : i32, i32
  }
  func.func @transform_5(%arg0: i32) -> (i32, i32) {
    %c0_i32 = arith.constant 0 : i32
    %c0_i32_0 = arith.constant 0 : i32
    return %arg0, %c0_i32 : i32, i32
  }
}

</mosaic_0001>

<bundles_post_ra>
// kernel: _ffn_impl.1
= control target key start
LH: loop header
LB: loop body
LE: loop exit
PB: predicated region body
PF: predicated region fallthrough
CT: control target
= control target key end

     0   :  { %v373_v0 = vmov 0.0   ;;  %vm374_vm0 = vmmov 0   ;;  %s471_s1 = inlined_call_operand.vmem [shape: bf16[128,128], index: 1, kind: input, shape index: {}]   ;;  %s472_s3 = inlined_call_operand.vmem [shape: bf16[128,128], index: 3, kind: input, shape index: {}]   ;;  %s473_s0 = inlined_call_operand.vmem [shape: f32[16,128], index: 0, kind: input, shape index: {}]   ;;  %s474_s2 = inlined_call_operand.vmem [shape: f32[1,128], index: 2, kind: input, shape index: {}]   ;;  %s475_s4 = inlined_call_operand.vmem [shape: f32[1,128], index: 4, kind: input, shape index: {}]   ;;  %s476_s5 = inlined_call_operand.vmem [shape: f32[16,128], index: 5, kind: output, shape index: {}]  }
   0x1   :  { %311 = vmatprep.subr.bf16.mxu0 %v373_v0  ;;  %v353_v1 = vld [vmem:[%s471_s1] sm:$0xff]   ;;  %327 = vmatprep.mubr.msk.bf16.mxu0 %vm374_vm0, %v373_v0  ;;  %v354_v2 = vld [vmem:[%s471_s1 + $0x8] sm:$0xff]   ;;  %v355_v3 = vld [vmem:[%s471_s1 + $0x10] sm:$0xff]  }
   0x2   :  { %331 = vmatprep.subr.bf16.mxu1 %v373_v0  ;;  %347 = vmatprep.mubr.msk.bf16.mxu1 %vm374_vm0, %v373_v0  ;;  %v361_v4 = vld [vmem:[%s472_s3] sm:$0xff]   ;;  %v356_v5 = vld [vmem:[%s471_s1 + $0x18] sm:$0xff]   ;;  %v362_v6 = vld [vmem:[%s472_s3 + $0x8] sm:$0xff]  }
   0x3   :  { %312 = vmatpush3.bf16.msra.mxu0 %v353_v1  ;;  %332 = vmatpush3.bf16.msra.mxu1 %v361_v4  ;;  %v357_v7 = vld [vmem:[%s471_s1 + $0x20] sm:$0xff]   ;;  %v358_v8 = vld [vmem:[%s471_s1 + $0x28] sm:$0xff]   ;;  %v359_v9 = vld [vmem:[%s471_s1 + $0x30] sm:$0xff]  }
   0x4   :  { %313 = vmatprep.subr.bf16.mxu0 %v373_v0  ;;  %333 = vmatprep.subr.bf16.mxu1 %v373_v0  ;;  %v360_v10 = vld [vmem:[%s471_s1 + $0x38] sm:$0xff]   ;;  %v21_v11 = vld [vmem:[%s473_s0] sm:$0xff]  ;;  %v22_v12 = vld [vmem:[%s473_s0 + $0x8] sm:$0xff] }
   0x5   :  { %v23_v13 = vpack.c.bf16 %v22_v12, %v21_v11  ;;  %v363_v14 = vld [vmem:[%s472_s3 + $0x10] sm:$0xff]   ;;  %v364_v15 = vld [vmem:[%s472_s3 + $0x18] sm:$0xff]   ;;  %v365_v16 = vld [vmem:[%s472_s3 + $0x20] sm:$0xff]  }
   0x6   :  { %v366_v17 = vld [vmem:[%s472_s3 + $0x28] sm:$0xff]   ;;  %v367_v18 = vld [vmem:[%s472_s3 + $0x30] sm:$0xff]   ;;  %v368_v19 = vld [vmem:[%s472_s3 + $0x38] sm:$0xff]  }
   0x7   :  { %314 = vmatpush3.bf16.msra.mxu0 %v354_v2  ;;  %334 = vmatpush3.bf16.msra.mxu1 %v362_v6  ;;  %v276_v20 = vld [vmem:[%s474_s2] ss:$0 sm:$0xff] }
   0x8   :  { %315 = vmatprep.subr.bf16.mxu0 %v373_v0  ;;  %335 = vmatprep.subr.bf16.mxu1 %v373_v0  ;;  %v275_v38 = vld [vmem:[%s475_s4] ss:$0 sm:$0xff] }
   0xb   :  { %316 = vmatpush3.bf16.msra.mxu0 %v355_v3  ;;  %336 = vmatpush3.bf16.msra.mxu1 %v363_v14 }
   0xc   :  { %317 = vmatprep.subr.bf16.mxu0 %v373_v0  ;;  %337 = vmatprep.subr.bf16.mxu1 %v373_v0 }
   0xf   :  { %318 = vmatpush3.bf16.msra.mxu0 %v356_v5  ;;  %338 = vmatpush3.bf16.msra.mxu1 %v364_v15 }
  0x10   :  { %319 = vmatprep.subr.bf16.mxu0 %v373_v0  ;;  %339 = vmatprep.subr.bf16.mxu1 %v373_v0 }
  0x13   :  { %320 = vmatpush3.bf16.msra.mxu0 %v357_v7  ;;  %340 = vmatpush3.bf16.msra.mxu1 %v365_v16 }
  0x14   :  { %321 = vmatprep.subr.bf16.mxu0 %v373_v0  ;;  %341 = vmatprep.subr.bf16.mxu1 %v373_v0 }
  0x17   :  { %322 = vmatpush3.bf16.msra.mxu0 %v358_v8  ;;  %342 = vmatpush3.bf16.msra.mxu1 %v366_v17 }
  0x18   :  { %323 = vmatprep.subr.bf16.mxu0 %v373_v0  ;;  %343 = vmatprep.subr.bf16.mxu1 %v373_v0 }
  0x1b   :  { %324 = vmatpush3.bf16.msra.mxu0 %v359_v9  ;;  %344 = vmatpush3.bf16.msra.mxu1 %v367_v18 }
  0x1c   :  { %325 = vmatprep.subr.bf16.mxu0 %v373_v0  ;;  %345 = vmatprep.subr.bf16.mxu1 %v373_v0 }
  0x1f   :  { %326 = vmatpush3.bf16.msra.mxu0 %v360_v10  ;;  %346 = vmatpush3.bf16.msra.mxu1 %v368_v19 }
  0x22   :  { %328 = vmatmul.mubr.bf16.vlgmr.msra.gmra.mrb[0].mxu0 %v23_v13 }
  0xf5   :  { %v154_v21 = vpop.f32.mrb[0].mxu0 }
  0xf6   :  { %v155_v22 = vadd.f32 %v276_v20, %v154_v21  ;;  %v329_v23 = vpop.f32.mrb[1].mxu0 }
  0xf7   :  { %v157_v24 = vpop.f32.mrb[2].mxu0 }
  0xf8   :  { %v163_v25 = vmul.f32 0.70710677, %v155_v22  ;;  %v158_v26 = vadd.f32 %v276_v20, %v157_v24  ;;  %v330_v27 = vpop.f32.mrb[3].mxu0  ;;  %v161_v32 = vmul.f32 0.5, %v155_v22 }
  0xfa   :  { %369 = verf.f32 %v163_v25  ;;  %v164_v28 = vmul.f32 0.70710677, %v158_v26  ;;  %v162_v33 = vmul.f32 0.5, %v158_v26 }
  0xfc   :  { %371 = verf.f32 %v164_v28 }
 0x104   :  { %v370_v29 = vpop.eup %369 }
 0x105   :  { %v167_v30 = vadd.f32 1.0, %v370_v29 }
 0x106   :  { %v372_v31 = vpop.eup %371 }
 0x107   :  { %v168_v34 = vadd.f32 1.0, %v372_v31  ;;  %v169_v35 = vmul.f32 %v167_v30, %v161_v32 }
 0x109   :  { %v170_v36 = vmul.f32 %v168_v34, %v162_v33 }
 0x10b   :  { %v173_v37 = vpack.c.bf16 %v170_v36, %v169_v35 }
 0x10d   :  { %348 = vmatmul.mubr.bf16.vlgmr.msra.gmra.mrb[0].mxu1 %v173_v37 }
 0x1e0   :  { %v256_v39 = vpop.f32.mrb[0].mxu1 }
 0x1e1   :  { %v263_v40 = vadd.f32 %v275_v38, %v256_v39  ;;  %v349_v41 = vpop.f32.mrb[1].mxu1 }
 0x1e2   :  { %v259_v42 = vpop.f32.mrb[2].mxu1 }
 0x1e3   :  { %269 = vst [vmem:[%s476_s5] sm:$0xff] %v263_v40  ;;  %v264_v43 = vadd.f32 %v275_v38, %v259_v42  ;;  %v350_v44 = vpop.f32.mrb[3].mxu1 }
 0x1e5   :  { %270 = vst [vmem:[%s476_s5 + $0x8] sm:$0xff] %v264_v43 }

// kernel: _ffn_impl.1
= control target key start
LH: loop header
LB: loop body
LE: loop exit
PB: predicated region body
PF: predicated region fallthrough
CT: control target
= control target key end

     0   :  { %v373_v0 = vmov 0.0   ;;  %vm374_vm0 = vmmov 0   ;;  %s471_s1 = inlined_call_operand.vmem [shape: bf16[128,128], index: 1, kind: input, shape index: {}]   ;;  %s472_s3 = inlined_call_operand.vmem [shape: bf16[128,128], index: 3, kind: input, shape index: {}]   ;;  %s473_s0 = inlined_call_operand.vmem [shape: f32[16,128], index: 0, kind: input, shape index: {}]   ;;  %s474_s2 = inlined_call_operand.vmem [shape: f32[1,128], index: 2, kind: input, shape index: {}]   ;;  %s475_s4 = inlined_call_operand.vmem [shape: f32[1,128], index: 4, kind: input, shape index: {}]   ;;  %s476_s5 = inlined_call_operand.vmem [shape: f32[16,128], index: 5, kind: output, shape index: {}]  }
   0x1   :  { %311 = vmatprep.subr.bf16.mxu0 %v373_v0  ;;  %v353_v1 = vld [vmem:[%s471_s1] sm:$0xff]   ;;  %327 = vmatprep.mubr.msk.bf16.mxu0 %vm374_vm0, %v373_v0  ;;  %v354_v2 = vld [vmem:[%s471_s1 + $0x8] sm:$0xff]   ;;  %v355_v3 = vld [vmem:[%s471_s1 + $0x10] sm:$0xff]  }
   0x2   :  { %331 = vmatprep.subr.bf16.mxu1 %v373_v0  ;;  %347 = vmatprep.mubr.msk.bf16.mxu1 %vm374_vm0, %v373_v0  ;;  %v361_v4 = vld [vmem:[%s472_s3] sm:$0xff]   ;;  %v356_v5 = vld [vmem:[%s471_s1 + $0x18] sm:$0xff]   ;;  %v362_v6 = vld [vmem:[%s472_s3 + $0x8] sm:$0xff]  }
   0x3   :  { %312 = vmatpush3.bf16.msra.mxu0 %v353_v1  ;;  %332 = vmatpush3.bf16.msra.mxu1 %v361_v4  ;;  %v357_v7 = vld [vmem:[%s471_s1 + $0x20] sm:$0xff]   ;;  %v358_v8 = vld [vmem:[%s471_s1 + $0x28] sm:$0xff]   ;;  %v359_v9 = vld [vmem:[%s471_s1 + $0x30] sm:$0xff]  }
   0x4   :  { %313 = vmatprep.subr.bf16.mxu0 %v373_v0  ;;  %333 = vmatprep.subr.bf16.mxu1 %v373_v0  ;;  %v360_v10 = vld [vmem:[%s471_s1 + $0x38] sm:$0xff]   ;;  %v21_v11 = vld [vmem:[%s473_s0] sm:$0xff]  ;;  %v22_v12 = vld [vmem:[%s473_s0 + $0x8] sm:$0xff] }
   0x5   :  { %v23_v13 = vpack.c.bf16 %v22_v12, %v21_v11  ;;  %v363_v14 = vld [vmem:[%s472_s3 + $0x10] sm:$0xff]   ;;  %v364_v15 = vld [vmem:[%s472_s3 + $0x18] sm:$0xff]   ;;  %v365_v16 = vld [vmem:[%s472_s3 + $0x20] sm:$0xff]  }
   0x6   :  { %v366_v17 = vld [vmem:[%s472_s3 + $0x28] sm:$0xff]   ;;  %v367_v18 = vld [vmem:[%s472_s3 + $0x30] sm:$0xff]   ;;  %v368_v19 = vld [vmem:[%s472_s3 + $0x38] sm:$0xff]  }
   0x7   :  { %314 = vmatpush3.bf16.msra.mxu0 %v354_v2  ;;  %334 = vmatpush3.bf16.msra.mxu1 %v362_v6  ;;  %v276_v20 = vld [vmem:[%s474_s2] ss:$0 sm:$0xff] }
   0x8   :  { %315 = vmatprep.subr.bf16.mxu0 %v373_v0  ;;  %335 = vmatprep.subr.bf16.mxu1 %v373_v0  ;;  %v275_v38 = vld [vmem:[%s475_s4] ss:$0 sm:$0xff] }
   0xb   :  { %316 = vmatpush3.bf16.msra.mxu0 %v355_v3  ;;  %336 = vmatpush3.bf16.msra.mxu1 %v363_v14 }
   0xc   :  { %317 = vmatprep.subr.bf16.mxu0 %v373_v0  ;;  %337 = vmatprep.subr.bf16.mxu1 %v373_v0 }
   0xf   :  { %318 = vmatpush3.bf16.msra.mxu0 %v356_v5  ;;  %338 = vmatpush3.bf16.msra.mxu1 %v364_v15 }
  0x10   :  { %319 = vmatprep.subr.bf16.mxu0 %v373_v0  ;;  %339 = vmatprep.subr.bf16.mxu1 %v373_v0 }
  0x13   :  { %320 = vmatpush3.bf16.msra.mxu0 %v357_v7  ;;  %340 = vmatpush3.bf16.msra.mxu1 %v365_v16 }
  0x14   :  { %321 = vmatprep.subr.bf16.mxu0 %v373_v0  ;;  %341 = vmatprep.subr.bf16.mxu1 %v373_v0 }
  0x17   :  { %322 = vmatpush3.bf16.msra.mxu0 %v358_v8  ;;  %342 = vmatpush3.bf16.msra.mxu1 %v366_v17 }
  0x18   :  { %323 = vmatprep.subr.bf16.mxu0 %v373_v0  ;;  %343 = vmatprep.subr.bf16.mxu1 %v373_v0 }
  0x1b   :  { %324 = vmatpush3.bf16.msra.mxu0 %v359_v9  ;;  %344 = vmatpush3.bf16.msra.mxu1 %v367_v18 }
  0x1c   :  { %325 = vmatprep.subr.bf16.mxu0 %v373_v0  ;;  %345 = vmatprep.subr.bf16.mxu1 %v373_v0 }
  0x1f   :  { %326 = vmatpush3.bf16.msra.mxu0 %v360_v10  ;;  %346 = vmatpush3.bf16.msra.mxu1 %v368_v19 }
  0x22   :  { %328 = vmatmul.mubr.bf16.vlgmr.msra.gmra.mrb[0].mxu0 %v23_v13 }
  0xf5   :  { %v154_v21 = vpop.f32.mrb[0].mxu0 }
  0xf6   :  { %v155_v22 = vadd.f32 %v276_v20, %v154_v21  ;;  %v329_v23 = vpop.f32.mrb[1].mxu0 }
  0xf7   :  { %v157_v24 = vpop.f32.mrb[2].mxu0 }
  0xf8   :  { %v163_v25 = vmul.f32 0.70710677, %v155_v22  ;;  %v158_v26 = vadd.f32 %v276_v20, %v157_v24  ;;  %v330_v27 = vpop.f32.mrb[3].mxu0  ;;  %v161_v32 = vmul.f32 0.5, %v155_v22 }
  0xfa   :  { %369 = verf.f32 %v163_v25  ;;  %v164_v28 = vmul.f32 0.70710677, %v158_v26  ;;  %v162_v33 = vmul.f32 0.5, %v158_v26 }
  0xfc   :  { %371 = verf.f32 %v164_v28 }
 0x104   :  { %v370_v29 = vpop.eup %369 }
 0x105   :  { %v167_v30 = vadd.f32 1.0, %v370_v29 }
 0x106   :  { %v372_v31 = vpop.eup %371 }
 0x107   :  { %v168_v34 = vadd.f32 1.0, %v372_v31  ;;  %v169_v35 = vmul.f32 %v167_v30, %v161_v32 }
 0x109   :  { %v170_v36 = vmul.f32 %v168_v34, %v162_v33 }
 0x10b   :  { %v173_v37 = vpack.c.bf16 %v170_v36, %v169_v35 }
 0x10d   :  { %348 = vmatmul.mubr.bf16.vlgmr.msra.gmra.mrb[0].mxu1 %v173_v37 }
 0x1e0   :  { %v256_v39 = vpop.f32.mrb[0].mxu1 }
 0x1e1   :  { %v263_v40 = vadd.f32 %v275_v38, %v256_v39  ;;  %v349_v41 = vpop.f32.mrb[1].mxu1 }
 0x1e2   :  { %v259_v42 = vpop.f32.mrb[2].mxu1 }
 0x1e3   :  { %269 = vst [vmem:[%s476_s5] sm:$0xff] %v263_v40  ;;  %v264_v43 = vadd.f32 %v275_v38, %v259_v42  ;;  %v350_v44 = vpop.f32.mrb[3].mxu1 }
 0x1e5   :  { %270 = vst [vmem:[%s476_s5 + $0x8] sm:$0xff] %v264_v43 }

</bundles_post_ra>
